<compile_context>
chip_gen: v6e
topology: v6e:2x2x1
jax: 0.10.0
libtpu: 0.0.40
codegen_flags: <defaults>
</compile_context>

<pallas_src>
import jax
import jax.numpy as jnp
from jax.experimental import pallas as pl
from jax.experimental.pallas import tpu as pltpu

_LANE = 128   # vreg lane width
_SUB = 8      # vreg sublane count


def _round_up(x: int, m: int) -> int:
    return ((x + m - 1) // m) * m


def _round_down(x: int, m: int) -> int:
    return (x // m) * m


def _linear_kernel(f_ref, w_ref, b_ref, o_ref):
    # f_ref: (tm, feat_dim)   w_ref: (feat_dim, N_pad)   b_ref: (1, N_pad)
    # One MXU matmul (f32 accumulation) + one VPU broadcast-add; lane-dense store.
    acc = jnp.dot(f_ref[...], w_ref[...], preferred_element_type=jnp.float32)
    o_ref[...] = (acc + b_ref[...].astype(jnp.float32)).astype(o_ref.dtype)


def prepare_params(w, b):
    """One-time parameter prep (do this at init, NOT per forward call).

    w: (num_classes, feat_dim) PyTorch-Linear layout; b: (num_classes,).
    Returns W^T zero-padded to a lane multiple along N, and bias as (1, N_pad).
    Padded columns are zero, so they contribute nothing and are never read back.
    """
    num_classes, feat_dim = w.shape
    n_pad = _round_up(num_classes, _LANE)
    wt = jnp.zeros((feat_dim, n_pad), w.dtype).at[:, :num_classes].set(w.T)
    b2 = jnp.zeros((1, n_pad), b.dtype).at[0, :num_classes].set(b)
    return wt, b2


def _vmem_budget_bytes() -> int:
    # Per-generation budget: half of physical VMEM (64 MiB on v5e/v6e, 32 MiB on
    # v7x).  Conservative 64 MiB fallback if the query is unavailable.
    try:
        physical = int(pltpu.get_tpu_info().vmem_capacity_bytes)
    except Exception:
        physical = 64 * 1024 * 1024
    return max(physical // 2, 16 * 1024 * 1024)


def label_classifier_forward_padded(f, wt, b2, *, tm_max: int = 1024):
    """Returns lane-padded logits (B, N_pad).  Consumers that can mask the padded
    columns (softmax / argmax / loss) should use this directly to avoid an extra
    HBM copy of the output."""
    B, feat_dim = f.shape
    k_w, n_pad = wt.shape
    assert k_w == feat_dim and n_pad % _LANE == 0
    itemsize = jnp.dtype(f.dtype).itemsize

    budget = _vmem_budget_bytes()
    # W and bias are double-buffered by the pipeline even with a constant
    # index_map -> count them 2x.  f tile + out tile are double-buffered too.
    resident = 2 * (feat_dim * n_pad + n_pad) * itemsize
    per_row = 2 * (feat_dim + n_pad) * itemsize
    tm_cap = max(_SUB, _round_down(max(budget - resident, per_row * _SUB) // per_row, _SUB))

    if B <= _SUB:
        tm = B                                   # block dim == full array dim is legal
    else:
        tm = max(_SUB, min(tm_max, tm_cap, _round_down(B, _SUB)))
        if B >= 2 * _SUB:
            # Guarantee >= 2 grid steps: both v7x TCs get work, pipeline overlaps.
            tm = min(tm, max(_SUB, _round_down(pl.cdiv(B, 2), _SUB)))

    grid = (pl.cdiv(B, tm),)

    cost = pl.CostEstimate(
        flops=2 * B * feat_dim * n_pad,
        transcendentals=0,
        bytes_accessed=(B * feat_dim + feat_dim * n_pad + n_pad + B * n_pad) * itemsize,
    )

    return pl.pallas_call(
        _linear_kernel,
        out_shape=jax.ShapeDtypeStruct((B, n_pad), f.dtype),
        grid_spec=pl.GridSpec(
            grid=grid,
            in_specs=[
                pl.BlockSpec((tm, feat_dim), lambda i: (i, 0)),    # f: tiled over batch, unpadded
                pl.BlockSpec((feat_dim, n_pad), lambda i: (0, 0)), # W^T: resident
                pl.BlockSpec((1, n_pad), lambda i: (0, 0)),        # bias: resident
            ],
            out_specs=pl.BlockSpec((tm, n_pad), lambda i: (i, 0)),
        ),
        compiler_params=pltpu.CompilerParams(
            dimension_semantics=("parallel",),
            vmem_limit_bytes=int(budget),
        ),
        cost_estimate=cost,
    )(f, wt, b2)


def label_classifier_forward(f, wt, b2, num_classes: int):
    """Exact nn.Linear semantics: (B, num_classes) logits."""
    out = label_classifier_forward_padded(f, wt, b2)
    if out.shape[1] == num_classes:
        return out
    # TODO(synk): this slice is an extra HBM copy; prefer the padded output when
    # the downstream op can ignore the zero-padded logit columns.
    return out[:, :num_classes]


def reference_forward(f, w, b):
    return f @ w.T + b


if __name__ == "__main__":
    # Small shapes consistent with the module: batch=8, feat_dim=32, classes=16.
    B, feat_dim, num_classes = 8, 32, 16

    key = jax.random.PRNGKey(0)
    kf, kw, kb = jax.random.split(key, 3)

    f = jax.random.normal(kf, (B, feat_dim), dtype=jnp.float32)
    # Deterministic parameter init (synthetic, mimics nn.Linear's uniform init range).
    bound = 1.0 / (feat_dim ** 0.5)
    w = jax.random.uniform(kw, (num_classes, feat_dim), jnp.float32, -bound, bound)
    b = jax.random.uniform(kb, (num_classes,), jnp.float32, -bound, bound)

    # One-time parameter prep (would be cached on the module in real use).
    wt, b2 = prepare_params(w, b)

    out = label_classifier_forward(f, wt, b2, num_classes)
    out = jax.block_until_ready(out)

    ref = reference_forward(f, w, b)
    assert out.shape == (B, num_classes)
    assert jnp.allclose(out, ref, atol=1e-5, rtol=1e-5)

    print("KERNEL_OK")
</pallas_src>

<mosaic_0001>
module attributes {stable_mosaic.version = 11 : i64} {
  func.func @_linear_kernel(%arg0: i32, %arg1: memref<8x32xf32, #tpu.memory_space<vmem>>, %arg2: memref<32x128xf32, #tpu.memory_space<vmem>>, %arg3: memref<1x128xf32, #tpu.memory_space<vmem>>, %arg4: memref<8x128xf32, #tpu.memory_space<vmem>>) attributes {dimension_semantics = [#tpu.dimension_semantics<parallel>], iteration_bounds = array<i64: 1>, scalar_prefetch = 0 : i64, scratch_operands = 0 : i64, tpu.core_type = #tpu.core_type<tc>, window_params = [{transform_indices = @transform_0, window_bounds = array<i64: 8, 32>}, {pipeline_mode = #tpu.pipeline_mode<synchronous>, transform_indices = @transform_1, window_bounds = array<i64: 32, 128>}, {pipeline_mode = #tpu.pipeline_mode<synchronous>, transform_indices = @transform_2, window_bounds = array<i64: 1, 128>}, {transform_indices = @transform_3, window_bounds = array<i64: 8, 128>}]} {
    %c0 = arith.constant 0 : index
    %c0_0 = arith.constant 0 : index
    %0 = vector.load %arg1[%c0, %c0_0] : memref<8x32xf32, #tpu.memory_space<vmem>>, vector<8x32xf32>
    %c0_1 = arith.constant 0 : index
    %c0_2 = arith.constant 0 : index
    %1 = vector.load %arg2[%c0_1, %c0_2] : memref<32x128xf32, #tpu.memory_space<vmem>>, vector<32x128xf32>
    %cst = arith.constant dense<0.000000e+00> : vector<8x128xf32>
    %2 = tpu.matmul %0, %1, %cst {dimension_numbers = #tpu.dot_dimension_numbers<[1], [0], [0], [1], [0, 0, 1, 1], [], []>} : vector<8x32xf32>, vector<32x128xf32>, vector<8x128xf32> -> vector<8x128xf32>
    %c0_3 = arith.constant 0 : index
    %c0_4 = arith.constant 0 : index
    %3 = vector.load %arg3[%c0_3, %c0_4] : memref<1x128xf32, #tpu.memory_space<vmem>>, vector<1x128xf32>
    %4 = vector.broadcast %3 : vector<1x128xf32> to vector<8x128xf32>
    %5 = arith.addf %2, %4 : vector<8x128xf32>
    %c0_5 = arith.constant 0 : index
    %c0_6 = arith.constant 0 : index
    %6 = vector.load %arg4[%c0_5, %c0_6] : memref<8x128xf32, #tpu.memory_space<vmem>>, vector<8x128xf32>
    tpu.vector_store %arg4[%c0_5, %c0_6], %5 {strides = array<i32>} : memref<8x128xf32, #tpu.memory_space<vmem>>, vector<8x128xf32>,
    return
  }
  func.func @transform_0(%arg0: i32) -> (i32, i32) {
    %c0_i32 = arith.constant 0 : i32
    %c0_i32_0 = arith.constant 0 : i32
    return %arg0, %c0_i32 : i32, i32
  }
  func.func @transform_1(%arg0: i32) -> (i32, i32) {
    %c0_i32 = arith.constant 0 : i32
    %c0_i32_0 = arith.constant 0 : i32
    %c0_i32_1 = arith.constant 0 : i32
    return %c0_i32, %c0_i32_0 : i32, i32
  }
  func.func @transform_2(%arg0: i32) -> (i32, i32) {
    %c0_i32 = arith.constant 0 : i32
    %c0_i32_0 = arith.constant 0 : i32
    %c0_i32_1 = arith.constant 0 : i32
    return %c0_i32, %c0_i32_0 : i32, i32
  }
  func.func @transform_3(%arg0: i32) -> (i32, i32) {
    %c0_i32 = arith.constant 0 : i32
    %c0_i32_0 = arith.constant 0 : i32
    return %arg0, %c0_i32 : i32, i32
  }
}

</mosaic_0001>

<bundles_post_ra>
// kernel: tpu_custom_call.1
= control target key start
LH: loop header
LB: loop body
LE: loop exit
PB: predicated region body
PF: predicated region fallthrough
CT: control target
= control target key end

     0   :  { %8 = vsyncpa [#allocation3], 0  ;;  %s274_s0 = inlined_call_operand.hbm [shape: f32[8,32], index: 0, kind: input, shape index: {}]   ;;  %s275_s1 = inlined_call_operand.hbm [shape: f32[32,128], index: 1, kind: input, shape index: {}]   ;;  %s276_s2 = inlined_call_operand.vmem [shape: f32[1,128], index: 2, kind: input, shape index: {}]   ;;  %s277_s3 = inlined_call_operand.hbm [shape: f32[8,128], index: 3, kind: output, shape index: {}]  }
   0x1   :  { %9 = vsyncpa [#allocation6], 0 }
   0x2   :  { %10 = vsyncpa [#allocation4], 0  ;;  %s235_s12 = smov [#allocation2]   ;;  %s236_s14 = smov [#allocation5]  }
   0x3   :  { %s17_s13 = sshll.u32 %s235_s12, 4  ;;  %s26_s15 = sshll.u32 %s236_s14, 4  ;;  %s18_s13 = int_to_ptr.vmem [resolvable:$true] %s17_s13  ;;  %s27_s15 = int_to_ptr.vmem [resolvable:$true] %s26_s15 }
   0x4   :  { %s177_s16 = scalar_lea.vmem %s18_s13, 128  ;;  %p182_p1 = scmp.lt.s32.totalorder %s18_s13, %s18_s13 }
   0x5   :  { %p178_p0 = scmp.ne.s32.totalorder %s18_s13, %s177_s16  ;;  %p183_p2 = scmp.lt.s32.totalorder %s177_s16, %s177_s16 }
   0x7   :  { %p184_p3 = por %p183_p2, %p182_p1 }
   0x9   :  { %p185_p4 = pnand %p184_p3, %p178_p0 }
   0xb   :  { %188 = shalt.err (!%p185_p4)
}
   0xc   :  { %20 = dma.hbm_to_vmem [thread:$0]  %s274_s0, 128, %s18_s13, [#allocation3]  }
   0xd   :  { %s197_s19 = scalar_lea.vmem %s27_s15, 512  ;;  %p202_p6 = scmp.lt.s32.totalorder %s27_s15, %s27_s15 }
   0xe   :  { %p198_p5 = scmp.ne.s32.totalorder %s27_s15, %s197_s19  ;;  %p203_p7 = scmp.lt.s32.totalorder %s197_s19, %s197_s19 }
  0x10   :  { %p204_p8 = por %p203_p7, %p202_p6 }
  0x12   :  { %p205_p9 = pnand %p204_p8, %p198_p5 }
  0x14   :  { %208 = shalt.err (!%p205_p9)
}
  0x15   :  { %s237_s20 = smov 128   ;;  %s238_s21 = smov 8  }
  0x16   :  { %32 = dma.hbm_to_vmem [thread:$0]  %s275_s1, 512, %s27_s15, [#allocation6], %s237_s20, %s237_s20, %s238_s21  }
  0x17   :  { %229 = dma.done.wait [#allocation3], 128  }
  0x18   :  { %230 = vsyncadd [#allocation3], 4294967168 }
  0x19   :  { %231 = dma.done.wait [#allocation6], 512  }
  0x1a   :  { %232 = vsyncadd [#allocation6], 4294966784  ;;  %v239_v0 = vmov 0.0   ;;  %vm240_vm0 = vmmov 0   ;;  %v45_v1 = vld [vmem:[#allocation5 + $0x18] sm:$0xff]  ;;  %v44_v2 = vld [vmem:[#allocation5 + $0x10] sm:$0xff] }
  0x1b   :  { %151 = vmatprep.subr.mxu0 %v239_v0  ;;  %159 = vmatprep.mubr.msk.f32.mxu0 %vm240_vm0, %v239_v0  ;;  %v43_v3 = vld [vmem:[#allocation5 + $0x8] sm:$0xff]  ;;  %v42_v4 = vld [vmem:[#allocation5] sm:$0xff]  ;;  %v41_v5 = vld [vmem:[#allocation2] sm:$0xff]  ;;  %vm53_vm1 = vcmask 261120   ;;  %s241_s24 = smov [#allocation7]  }
  0x1c   :  { %152 = vmatpush3.msra.mxu0 %v45_v1  ;;  %v144_v6 = vld [vmem:[%s276_s2] ss:$0 sm:$0xff]  ;;  %s134_s25 = sshll.u32 %s241_s24, 4  ;;  %s135_s25 = int_to_ptr.vmem [resolvable:$true] %s134_s25 }
  0x1d   :  { %153 = vmatprep.subr.mxu0 %v239_v0  ;;  %s209_s26 = scalar_lea.vmem %s135_s25, 128  ;;  %p214_p11 = scmp.lt.s32.totalorder %s135_s25, %s135_s25 }
  0x1e   :  { %154 = vmatpush3.msra.mxu0 %v44_v2  ;;  %p210_p10 = scmp.ne.s32.totalorder %s135_s25, %s209_s26  ;;  %p215_p12 = scmp.lt.s32.totalorder %s209_s26, %s209_s26 }
  0x1f   :  { %155 = vmatprep.subr.mxu0 %v239_v0 }
  0x20   :  { %156 = vmatpush3.msra.mxu0 %v43_v3  ;;  %p216_p13 = por %p215_p12, %p214_p11 }
  0x21   :  { %157 = vmatprep.subr.mxu0 %v239_v0 }
  0x22   :  { %158 = vmatpush3.msra.mxu0 %v42_v4  ;;  %p217_p0 = pnand %p216_p13, %p210_p10 }
  0x23   :  { %160 = vmatmul.mubr.msk.f32.vlgmr.msra.gmra.mxu0 %vm53_vm1, %v41_v5 }
  0xe3   :  { %v123_v7 = vpop.f32.mrf.mxu0 }
  0xe4   :  { %v124_v8 = vadd.f32 %v144_v6, %v123_v7 }
  0xe5   :  { %v161_v9 = vpop.f32.mrf.mxu0 }
  0xe6   :  { %127 = vst [vmem:[#allocation7] sm:$0xff] %v124_v8 }
  0xe7   :  { %220 = shalt.err (!%p217_p0)
}
  0xe8   :  { %137 = dma.vmem_to_hbm [thread:$0]  %s135_s25, 128, %s277_s3, [#allocation4]  }
  0xe9   :  { %233 = dma.done.wait [#allocation4], 128  }
  0xea   :  { %234 = vsyncadd [#allocation4], 4294967168 }
  0xeb   :  { %141 = vsyncpa [#allocation3], 1 }
  0xec   :  { %142 = vsyncpa [#allocation6], 1 }
  0xed   :  { %143 = vsyncpa [#allocation4], 1 }

</bundles_post_ra>
